<compile_context>
chip_gen: v5e
topology: v5e:2x2
jax: 0.10.0
libtpu: 0.0.40
codegen_flags: <defaults>
</compile_context>

<pallas_src>
import functools

import jax
import jax.numpy as jnp
from jax.experimental import pallas as pl
from jax.experimental.pallas import tpu as pltpu


def _round_up(x, m):
    return (x + m - 1) // m * m


def _pick_divisor_tile(dim, cap):
    """Largest multiple of 128 that divides `dim` (itself a multiple of 128), <= cap."""
    cap = max(128, min(cap, dim))
    best = 128
    d = 128
    while d <= cap:
        if dim % d == 0:
            best = d
        d += 128
    return best


# ----------------------- layer-1 tiled matmul kernel -------------------------
def _linear_kernel(x_ref, w_ref, b_ref, o_ref, acc_ref, *, apply_relu):
    """One (tm, tn) output tile of y = x @ w (+ b) [+ relu], K-tiled reduction.

    x_ref: (tm, tk) bf16   w_ref: (tk, tn) bf16 (pre-transposed to (K, N))
    b_ref: (1, tn)  f32    o_ref: (tm, tn)      acc_ref: (tm, tn) f32 scratch
    """
    k = pl.program_id(2)

    @pl.when(k == 0)
    def _():
        acc_ref[...] = jnp.zeros_like(acc_ref)

    # bf16 x bf16 -> f32 accumulation on the MXU; no in-kernel transpose.
    acc_ref[...] += jnp.dot(x_ref[...], w_ref[...],
                            preferred_element_type=jnp.float32)

    @pl.when(k == pl.num_programs(2) - 1)
    def _():
        y = acc_ref[...] + b_ref[...]          # bias folded into finalize (f32)
        if apply_relu:
            y = jnp.maximum(y, 0.0)
        o_ref[...] = y.astype(o_ref.dtype)


def _linear_pallas_padded(xp, wt, bp, *, tm, relu, out_dtype=jnp.bfloat16,
                          tk_cap=3584, tn_cap=512):
    """y = xp @ wt + bp on pre-padded operands.  Returns padded (Mp, Np) output."""
    Mp, Kp = xp.shape
    Kp2, Np = wt.shape
    assert Kp == Kp2 and bp.shape == (1, Np) and Mp % tm == 0

    # Reduction tile: exact divisor of padded K so no HBM traffic is spent on
    # K-padding zeros (3584 for the real 25088-wide layer).
    tk = _pick_divisor_tile(Kp, tk_cap)
    # Keep >=2 N blocks when possible so the "parallel" axis spans both v7x TCs.
    tn = _pick_divisor_tile(Np, min(tn_cap, Np // 2 if Np >= 256 else Np))

    grid = (Mp // tm, Np // tn, Kp // tk)

    return pl.pallas_call(
        functools.partial(_linear_kernel, apply_relu=relu),
        out_shape=jax.ShapeDtypeStruct((Mp, Np), out_dtype),
        grid_spec=pltpu.PrefetchScalarGridSpec(
            num_scalar_prefetch=0,
            grid=grid,
            in_specs=[
                pl.BlockSpec((tm, tk), lambda i, j, k: (i, k)),
                pl.BlockSpec((tk, tn), lambda i, j, k: (k, j)),
                pl.BlockSpec((1, tn), lambda i, j, k: (0, j)),
            ],
            out_specs=pl.BlockSpec((tm, tn), lambda i, j, k: (i, j)),
            scratch_shapes=[pltpu.VMEM((tm, tn), jnp.float32)],
        ),
        compiler_params=pltpu.CompilerParams(
            dimension_semantics=("parallel", "parallel", "arbitrary")),
    )(xp, wt, bp)


# -------------------- fused layer-2 + layer-3 tail kernel --------------------
def _tail_kernel(h1_ref, w2_ref, b2_ref, w3_ref, b3_ref, o_ref):
    """logits = relu(h1 @ W2 + b2) @ W3 + b3 for one (tm, :) row stripe.

    W2/W3 (already transposed to (K, N) and padded) are whole-array VMEM inputs:
    2 MB + 0.25 MB bf16 at real VGG scale, trivially resident on every chip.
    """
    h2 = jnp.dot(h1_ref[...], w2_ref[...], preferred_element_type=jnp.float32)
    h2 = jnp.maximum(h2 + b2_ref[...], 0.0).astype(jnp.bfloat16)
    y = jnp.dot(h2, w3_ref[...], preferred_element_type=jnp.float32) + b3_ref[...]
    o_ref[...] = y.astype(o_ref.dtype)


def _tail_pallas(h1p, w2t, b2p, w3t, b3p, *, tm):
    Mp, H1p = h1p.shape
    H1p2, H2p = w2t.shape
    H2p2, Cp = w3t.shape
    assert H1p == H1p2 and H2p == H2p2 and Mp % tm == 0

    return pl.pallas_call(
        _tail_kernel,
        out_shape=jax.ShapeDtypeStruct((Mp, Cp), jnp.float32),
        grid_spec=pltpu.PrefetchScalarGridSpec(
            num_scalar_prefetch=0,
            grid=(Mp // tm,),
            in_specs=[
                pl.BlockSpec((tm, H1p), lambda i: (i, 0)),
                pl.BlockSpec((H1p, H2p), lambda i: (0, 0)),
                pl.BlockSpec((1, H2p), lambda i: (0, 0)),
                pl.BlockSpec((H2p, Cp), lambda i: (0, 0)),
                pl.BlockSpec((1, Cp), lambda i: (0, 0)),
            ],
            out_specs=pl.BlockSpec((tm, Cp), lambda i: (i, 0)),
        ),
        compiler_params=pltpu.CompilerParams(
            dimension_semantics=("parallel",)),
    )(h1p, w2t, b2p, w3t, b3p)


# --------------------------- parameter preparation ---------------------------
def prepare_classifier_params(params):
    """One-time prep: transpose to (K, N), cast to bf16, pad lane-dense.

    PyTorch Linear stores (out_features, in_features); we pre-transpose so the
    kernels never pay an XLU transpose or a per-forward HBM re-write.
    """
    (w1, b1), (w2, b2), (w3, b3) = params

    def prep(w, b):
        n, k = w.shape
        kp, np_ = _round_up(k, 128), _round_up(n, 128)
        wt = jnp.zeros((kp, np_), jnp.bfloat16).at[:k, :n].set(
            jnp.transpose(w).astype(jnp.bfloat16))
        bp = jnp.zeros((1, np_), jnp.float32).at[0, :n].set(b.astype(jnp.float32))
        return wt, bp

    w1t, b1p = prep(w1, b1)
    w2t, b2p = prep(w2, b2)
    w3t, b3p = prep(w3, b3)
    assert w2t.shape[0] == w1t.shape[1]     # padded hidden dims line up
    assert w3t.shape[0] == w2t.shape[1]
    return dict(w1t=w1t, b1=b1p, w2t=w2t, b2=b2p, w3t=w3t, b3=b3p,
                in_features=w1.shape[1], num_classes=w3.shape[0])


# --------------------------------- forward -----------------------------------
def vgg_classifier_forward(x, prepped):
    """x: (B, C, H, W) feature map (post features+avgpool) -> (B, num_classes)."""
    B = x.shape[0]
    x2d = x.reshape(B, -1)                               # x.view(B, 512*7*7)
    K = x2d.shape[1]
    assert K == prepped["in_features"]
    Kp = prepped["w1t"].shape[0]

    tm = min(256, _round_up(B, 16))                      # bf16 sublane packing
    Mp = _round_up(B, tm)

    # Only the activation is padded/cast per forward; weights are pre-prepared.
    xp = jnp.zeros((Mp, Kp), jnp.bfloat16).at[:B, :K].set(x2d.astype(jnp.bfloat16))

    # Layer 1: tiled K-reduction matmul, fused bias + ReLU, padded bf16 output.
    h1p = _linear_pallas_padded(xp, prepped["w1t"], prepped["b1"], tm=tm, relu=True)

    # Layers 2 + 3 fused in one kernel; activations stay padded between layers.
    logits_p = _tail_pallas(h1p, prepped["w2t"], prepped["b2"],
                            prepped["w3t"], prepped["b3"], tm=tm)

    return logits_p[:B, :prepped["num_classes"]]


# ------------------------- pure-JAX reference (same bf16-operand math) --------
def _ref_forward(x, params):
    (w1, b1), (w2, b2), (w3, b3) = params
    B = x.shape[0]
    x2d = x.reshape(B, -1)

    def lin(h, w, b, relu):
        y = jnp.dot(h.astype(jnp.bfloat16), jnp.transpose(w).astype(jnp.bfloat16),
                    preferred_element_type=jnp.float32) + b.astype(jnp.float32)
        return jnp.maximum(y, 0.0) if relu else y

    h1 = lin(x2d, w1, b1, True).astype(jnp.bfloat16)
    h2 = lin(h1, w2, b2, True).astype(jnp.bfloat16)
    return lin(h2, w3, b3, False)


if __name__ == "__main__":
    # Scaled-down VGG classifier shapes (real VGG16: channels=512, hidden=1024,
    # in_features=25088 -- same code path, only bigger grids).
    batch, channels, spatial = 2, 32, 7
    in_features = channels * spatial * spatial   # 1568
    hidden = 256
    num_classes = 5

    key = jax.random.PRNGKey(0)
    kx, k1, k2, k3, k4, k5, k6 = jax.random.split(key, 7)

    # Feature map as produced by features+avgpool (backbone not translated).
    x = jax.random.normal(kx, (batch, channels, spatial, spatial), jnp.float32)

    def linear_init(kw, kb, n_out, n_in):
        bound = (1.0 / n_in) ** 0.5
        w = jax.random.uniform(kw, (n_out, n_in), jnp.float32, -bound, bound)
        b = jax.random.uniform(kb, (n_out,), jnp.float32, -bound, bound)
        return w, b

    params = (
        linear_init(k1, k2, hidden, in_features),
        linear_init(k3, k4, hidden, hidden),
        linear_init(k5, k6, num_classes, hidden),
    )

    # One-time weight preparation (transpose / bf16 / pad) — NOT per forward.
    prepped = prepare_classifier_params(params)
    prepped = jax.tree_util.tree_map(
        lambda a: jax.block_until_ready(a) if isinstance(a, jnp.ndarray) else a,
        prepped)

    y = vgg_classifier_forward(x, prepped)
    y = jax.block_until_ready(y)

    ref = _ref_forward(x, params)
    assert y.shape == (batch, num_classes)
    # bf16 MXU operands (f32 accumulation) are intentional; tolerance reflects that.
    assert jnp.allclose(y, ref, atol=2e-2, rtol=2e-2)

    print("KERNEL_OK")
</pallas_src>

<mosaic_0001>
module attributes {stable_mosaic.version = 11 : i64} {
  func.func @_linear_kernel(%arg0: i32, %arg1: i32, %arg2: i32, %arg3: memref<16x1664xbf16, #tpu.memory_space<vmem>>, %arg4: memref<1664x128xbf16, #tpu.memory_space<vmem>>, %arg5: memref<1x128xf32, #tpu.memory_space<vmem>>, %arg6: memref<16x128xbf16, #tpu.memory_space<vmem>>, %arg7: memref<16x128xf32, #tpu.memory_space<vmem>>) attributes {dimension_semantics = [#tpu.dimension_semantics<parallel>, #tpu.dimension_semantics<parallel>, #tpu.dimension_semantics<arbitrary>], iteration_bounds = array<i64: 1, 2, 1>, scalar_prefetch = 0 : i64, scratch_operands = 1 : i64, tpu.core_type = #tpu.core_type<tc>, window_params = [{transform_indices = @transform_0, window_bounds = array<i64: 16, 1664>}, {transform_indices = @transform_1, window_bounds = array<i64: 1664, 128>}, {transform_indices = @transform_2, window_bounds = array<i64: 1, 128>}, {transform_indices = @transform_3, window_bounds = array<i64: 16, 128>}]} {
    %c0_i32 = arith.constant 0 : i32
    %0 = arith.cmpi eq, %arg2, %c0_i32 : i32
    %1 = arith.extui %0 : i1 to i32
    %c0_i32_0 = arith.constant 0 : i32
    %2 = arith.cmpi ne, %1, %c0_i32_0 : i32
    scf.if %2 {
      %cst_10 = arith.constant 0.000000e+00 : f32
      %12 = vector.broadcast %cst_10 : f32 to vector<16x128xf32>
      %c0_11 = arith.constant 0 : index
      %c0_12 = arith.constant 0 : index
      %13 = vector.load %arg7[%c0_11, %c0_12] : memref<16x128xf32, #tpu.memory_space<vmem>>, vector<16x128xf32>
      tpu.vector_store %arg7[%c0_11, %c0_12], %12 {strides = array<i32>} : memref<16x128xf32, #tpu.memory_space<vmem>>, vector<16x128xf32>,
    } else {
    }
    %c0 = arith.constant 0 : index
    %c0_1 = arith.constant 0 : index
    %3 = vector.load %arg7[%c0, %c0_1] : memref<16x128xf32, #tpu.memory_space<vmem>>, vector<16x128xf32>
    %c0_2 = arith.constant 0 : index
    %c0_3 = arith.constant 0 : index
    %4 = vector.load %arg3[%c0_2, %c0_3] : memref<16x1664xbf16, #tpu.memory_space<vmem>>, vector<16x1664xbf16>
    %c0_4 = arith.constant 0 : index
    %c0_5 = arith.constant 0 : index
    %5 = vector.load %arg4[%c0_4, %c0_5] : memref<1664x128xbf16, #tpu.memory_space<vmem>>, vector<1664x128xbf16>
    %cst = arith.constant dense<0.000000e+00> : vector<16x128xf32>
    %6 = tpu.matmul %4, %5, %cst {dimension_numbers = #tpu.dot_dimension_numbers<[1], [0], [0], [1], [0, 0, 1, 1], [], []>} : vector<16x1664xbf16>, vector<1664x128xbf16>, vector<16x128xf32> -> vector<16x128xf32>
    %7 = arith.addf %3, %6 : vector<16x128xf32>
    %c0_6 = arith.constant 0 : index
    %c0_7 = arith.constant 0 : index
    %8 = vector.load %arg7[%c0_6, %c0_7] : memref<16x128xf32, #tpu.memory_space<vmem>>, vector<16x128xf32>
    tpu.vector_store %arg7[%c0_6, %c0_7], %7 {strides = array<i32>} : memref<16x128xf32, #tpu.memory_space<vmem>>, vector<16x128xf32>,
    %c0_i32_8 = arith.constant 0 : i32
    %9 = arith.cmpi eq, %arg2, %c0_i32_8 : i32
    %10 = arith.extui %9 : i1 to i32
    %c0_i32_9 = arith.constant 0 : i32
    %11 = arith.cmpi ne, %10, %c0_i32_9 : i32
    scf.if %11 {
      %c0_10 = arith.constant 0 : index
      %c0_11 = arith.constant 0 : index
      %12 = vector.load %arg7[%c0_10, %c0_11] : memref<16x128xf32, #tpu.memory_space<vmem>>, vector<16x128xf32>
      %c0_12 = arith.constant 0 : index
      %c0_13 = arith.constant 0 : index
      %13 = vector.load %arg5[%c0_12, %c0_13] : memref<1x128xf32, #tpu.memory_space<vmem>>, vector<1x128xf32>
      %14 = vector.broadcast %13 : vector<1x128xf32> to vector<16x128xf32>
      %15 = arith.addf %12, %14 : vector<16x128xf32>
      %cst_14 = arith.constant 0.000000e+00 : f32
      %16 = vector.broadcast %cst_14 : f32 to vector<16x128xf32>
      %17 = arith.maximumf %15, %16 : vector<16x128xf32>
      %18 = arith.truncf %17 : vector<16x128xf32> to vector<16x128xbf16>
      %c0_15 = arith.constant 0 : index
      %c0_16 = arith.constant 0 : index
      %19 = vector.load %arg6[%c0_15, %c0_16] : memref<16x128xbf16, #tpu.memory_space<vmem>>, vector<16x128xbf16>
      tpu.vector_store %arg6[%c0_15, %c0_16], %18 {strides = array<i32>} : memref<16x128xbf16, #tpu.memory_space<vmem>>, vector<16x128xbf16>,
    } else {
    }
    return
  }
  func.func @transform_0(%arg0: i32, %arg1: i32, %arg2: i32) -> (i32, i32) {
    %c0_i32 = arith.constant 0 : i32
    return %arg0, %arg2 : i32, i32
  }
  func.func @transform_1(%arg0: i32, %arg1: i32, %arg2: i32) -> (i32, i32) {
    %c0_i32 = arith.constant 0 : i32
    return %arg2, %arg1 : i32, i32
  }
  func.func @transform_2(%arg0: i32, %arg1: i32, %arg2: i32) -> (i32, i32) {
    %c0_i32 = arith.constant 0 : i32
    %c0_i32_0 = arith.constant 0 : i32
    return %c0_i32, %arg1 : i32, i32
  }
  func.func @transform_3(%arg0: i32, %arg1: i32, %arg2: i32) -> (i32, i32) {
    %c0_i32 = arith.constant 0 : i32
    return %arg0, %arg1 : i32, i32
  }
}

</mosaic_0001>

<bundles_post_ra>
// kernel: tpu_custom_call.1
= control target key start
LH: loop header
LB: loop body
LE: loop exit
PB: predicated region body
PF: predicated region fallthrough
CT: control target
= control target key end

     0   :  { %8 = vsyncpa [#allocation4], 0  ;;  %s2717_s0 = inlined_call_operand.hbm [shape: bf16[16,1664], index: 0, kind: input, shape index: {}]   ;;  %s2718_s1 = inlined_call_operand.hbm [shape: bf16[1664,256], index: 1, kind: input, shape index: {}]   ;;  %s2719_s2 = inlined_call_operand.hbm [shape: f32[1,256], index: 2, kind: input, shape index: {}]   ;;  %s2720_s3 = inlined_call_operand.hbm [shape: bf16[16,256], index: 3, kind: output, shape index: {}]  }
   0x1   :  { %9 = vsyncpa [#allocation7], 0 }
   0x2   :  { %11 = vsyncpa [#allocation7 + $0x1], 0 }
   0x3   :  { %12 = vsyncpa [#allocation5], 0 }
   0x4   :  { %14 = vsyncpa [#allocation5 + $0x1], 0  ;;  %s2443_s12 = smov 0   ;;  %s2445_s13 = smov 0  }
   0x5   :  { %s2447_s14 = smov 0   ;;  %s2449_s15 = smov 0  }
   0x6   :  { %s2451_s16 = smov 0   ;;  %s2453_s17 = smov 0  }
   0x7 LB: > { %s35_s18 = sadd.s32 1, %s2408_s16  ;;  %s76_s19 = sadd.s32 1, %s2400_s14  ;;  %s2412_s17 = sphi %s2453_s17, %s20_s17   ;;  %s2408_s16 = sphi %s2451_s16, %s2730_s16   ;;  %s2404_s15 = sphi %s2449_s15, %s2729_s15   ;;  %s2400_s14 = sphi %s2447_s14, %s2728_s14   ;;  %s2396_s13 = sphi %s2445_s13, %s2727_s13   ;;  %s2392_s12 = sphi %s2443_s12, %s2726_s12  }
   0x8   : > { %p37_p0 = scmp.ge.s32.totalorder %s35_s18, 2  ;;  %p83_p1 = scmp.ne.s32.totalorder %s2400_s14, %s2396_s13 }
   0x9   : > { %p84_p2 = scmp.eq.s32.totalorder %s2412_s17, 0  ;;  %p1548_p3 = scmp.ge.s32.totalorder %s2412_s17, 2 }
   0xa   : > { %s2732_s18 = smov (%p37_p0, %s35_s18), 0  ;;  %p2175_p5 = scmp.lt.s32.totalorder %s2412_s17, 2 }
   0xb   : > { %p85_p4 = por %p84_p2, %p83_p1  ;;  %s72_s20 = ssub.s32 %s2408_s16, %s2732_s18 }
   0xc   : > { %s187_s21 = sand.u32 1, %s2412_s17   ;;  %p74_p6 = scmp.eq.s32.totalorder %s72_s20, 0 }
   0xd   : > { %s189_s22 = sand.u32 1, %s2400_s14   ;;  %s1549_s23 = sshll.u32 %s2408_s16, 2 }
   0xe   : > { %s2491_s24 = scalar_select %p74_p6, %s2400_s14, %s76_s19  }
   0xf   : > { %s2147_s25 = smul.u32 832, %s189_s22  ;;  %s198_s28 = scalar_lea.hbm %s2718_s1, %s1549_s23 }
  0x10   : > { %s199_s29 = sshll.u32 %s198_s28, 4  ;;  %p2498_p7 = pnand %p2175_p5, %p85_p4  ;;  %s200_s29 = int_to_ptr.hbm [resolvable:$true] %s199_s29 }
  0x11   : > { %s191_s4 = scalar_lea.vmem [#allocation6], %s2147_s25  ;;  %s2502_s6 = scalar_lea.sflag [#allocation7], %s187_s21 }
  0x12   : > { %s201_s5 = sshll.u32 %s191_s4, 4  ;;  %s2414_s7 = smov 128   ;;  %s202_s5 = int_to_ptr.vmem [resolvable:$true] %s201_s5 }
  0x13   : > { %s2415_s8 = smov 64   ;;  %s2416_s9 = smov 4  }
  0x14   : > { %2166 = dma.hbm_to_vmem [thread:$0]  (!%p2498_p7), %s200_s29, 13312, %s202_s5, %s2502_s6, %s2414_s7, %s2415_s8, %s2416_s9  }
  0x15   : > { %s2508_s10 = sadd.s32 4294967295, %s2412_s17   ;;  %s1545_s11 = sadd.s32 4294967294, %s2412_s17  }
  0x16   : > { %p89_p8 = scmp.ne.s32.totalorder %s2396_s13, %s2392_s12  ;;  %p90_p9 = scmp.eq.s32.totalorder %s2508_s10, 0 }
  0x17   : > { %p141_p10 = scmp.eq.s32.totalorder %s2508_s10, 1  ;;  %p147_p11 = scmp.eq.s32.totalorder %s1545_s11, 1 }
  0x18   : > { %p2517_p12 = por %p90_p9, %p89_p8  ;;  %p1546_p13 = scmp.ge.s32.totalorder %s2412_s17, 1 }
  0x19   : > { %p2525_p0 = por %p141_p10, %p83_p1  ;;  %p2529_p2 = por %p147_p11, %p89_p8 }
  0x1a   : > { %p154_p4 = scmp.lt.s32.totalorder %s2412_s17, 3  ;;  %s171_s26 = sshll.u32 %s2717_s0, 4  ;;  %s172_s26 = int_to_ptr.hbm [resolvable:$true] %s171_s26 }
  0x1b   : > { %s2417_s28 = smov [#allocation3]   ;;  %s217_s7 = scalar_lea.hbm %s2719_s2, %s2408_s16 }
  0x1c   : > { %p2537_p5 = pnand %p1546_p13, %p154_p4  ;;  %s173_s29 = sshll.u32 %s2417_s28, 4  ;;  %s174_s29 = int_to_ptr.vmem [resolvable:$true] %s173_s29 }
  0x1d   : > { %s219_s8 = sshll.u32 %s217_s7, 4  ;;  %s214_s9 = scalar_lea.vmem [#allocation8], %s189_s22  ;;  %s220_s8 = int_to_ptr.hbm [resolvable:$true] %s219_s8 }
  0x1e   : > { %p2159_p1 = pneg %p2537_p5  ;;  %s221_s11 = sshll.u32 %s214_s9, 4  ;;  %s222_s11 = int_to_ptr.vmem [resolvable:$true] %s221_s11 }
  0x1f   : > { %s2418_s23 = smov 832   ;;  %s2419_s25 = smov 52  }
  0x20   : > { %p2160_p6 = pnand %p2159_p1, %p90_p9  ;;  %230 = sbr.rel (%p2537_p5) target bundleno = 318 (0x13e), region = 32 }
  0x21   : > { %2169 = dma.hbm_to_vmem [thread:$0]  (!%p2498_p7), %s220_s8, 16, %s222_s11, %s2502_s6  }
  0x22   : > { %2162 = dma.hbm_to_vmem [thread:$0]  (!%p2160_p6), %s172_s26, 1664, %s174_s29, [#allocation4], %s2418_s23, %s2418_s23, %s2419_s25  }
  0x25   : > { %2379 = dma.done.wait (%p90_p9), [#allocation4], 1664  }
  0x26   : > { %2381 = vsyncadd (%p90_p9), [#allocation4], 4294965632  ;;  %s237_s22 = sand.u32 1, %s2508_s10   ;;  %s2562_s28 = sand.u32 1, %s2396_s13  }
  0x27   : > { %s2148_s26 = smul.u32 832, %s2562_s28  ;;  %s238_s29 = scalar_lea.sflag [#allocation7], %s237_s22 }
  0x29   : > { %s2565_s30 = scalar_lea.vmem [#allocation6], %s2148_s26 }
  0x2a   : > { %2383 = dma.done.wait (%p2517_p12), %s238_s29, 13328  }
  0x2b   : > { %2385 = vsyncadd (%p2517_p12), %s238_s29, 4294953968  ;;  %v2045_v0 = vld [vmem:[%s2565_s30 + $0x38] sm:$0xff]  ;;  %v2044_v4 = vld [vmem:[%s2565_s30 + $0x30] sm:$0xff]  ;;  %s250_s6 = scalar_lea.vmem [#allocation8], %s2562_s28  ;;  %s1552_s10 = sshll.u32 %s2562_s28, 3 }
  0x2c   : > { %v2061_v1 = vld [vmem:[%s2565_s30 + $0xb8] sm:$0xff]  ;;  %1202 = vmatpush.bf16.msra.mxu0 %v2045_v0  ;;  %v2060_v5 = vld [vmem:[%s2565_s30 + $0xb0] sm:$0xff]  ;;  %v2043_v8 = vld [vmem:[%s2565_s30 + $0x28] sm:$0xff]  ;;  %s2022_s19 = sshll.u32 %s2404_s15, 2  ;;  %s277_s7 = scalar_lea.vmem [#allocation9], %s1552_s10 }
  0x2d   : > { %v2053_v2 = vld [vmem:[%s2565_s30 + $0x78] sm:$0xff]  ;;  %1230 = vmatpush.bf16.msra.mxu2 %v2061_v1  ;;  %v2052_v6 = vld [vmem:[%s2565_s30 + $0x70] sm:$0xff]  ;;  %v2059_v9 = vld [vmem:[%s2565_s30 + $0xa8] sm:$0xff]  ;;  %s1419_s5 = scalar_lea.hbm %s2720_s3, %s2022_s19  ;;  %s1420_s8 = sshll.u32 %s277_s7, 4  ;;  %s1421_s8 = int_to_ptr.vmem [resolvable:$true] %s1420_s8 }
  0x2e   : > { %v2069_v3 = vld [vmem:[%s2565_s30 + $0xf8] sm:$0xff]  ;;  %1216 = vmatpush.bf16.msra.mxu1 %v2053_v2  ;;  %v2068_v7 = vld [vmem:[%s2565_s30 + $0xf0] sm:$0xff]  ;;  %v2051_v10 = vld [vmem:[%s2565_s30 + $0x68] sm:$0xff]  ;;  %s1422_s9 = sshll.u32 %s1419_s5, 4  ;;  %s1406_s15 = scalar_lea.sflag [#allocation5], %s2562_s28  ;;  %s1423_s9 = int_to_ptr.hbm [resolvable:$true] %s1422_s9 }
  0x2f   : > { %1244 = vmatpush.bf16.msra.mxu3 %v2069_v3  ;;  %v2067_v11 = vld [vmem:[%s2565_s30 + $0xe8] sm:$0xff]  ;;  %v2042_v12 = vld [vmem:[%s2565_s30 + $0x20] sm:$0xff]  ;;  %v2041_v16 = vld [vmem:[%s2565_s30 + $0x18] sm:$0xff]  ;;  %s2340_s11 = sshra.s32 %s1423_s9, 4  ;;  %s2346_s26 = scalar_lea.hbm %s2720_s3, 16  ;;  %s2341_s11 = int_to_ptr.hbm [resolvable:$true] %s2340_s11 }
  0x30   : > { %1203 = vmatpush.bf16.msra.mxu0 %v2044_v4  ;;  %v2058_v13 = vld [vmem:[%s2565_s30 + $0xa0] sm:$0xff]  ;;  %v2057_v17 = vld [vmem:[%s2565_s30 + $0x98] sm:$0xff]  ;;  %v2040_v20 = vld [vmem:[%s2565_s30 + $0x10] sm:$0xff]  ;;  %s2342_s23 = scalar_lea.hbm %s2341_s11, 8  ;;  %p2347_p10 = scmp.lt.s32.totalorder %s2341_s11, %s2720_s3 }
  0x31   : > { %1231 = vmatpush.bf16.msra.mxu2 %v2060_v5  ;;  %v2050_v14 = vld [vmem:[%s2565_s30 + $0x60] sm:$0xff]  ;;  %v2049_v18 = vld [vmem:[%s2565_s30 + $0x58] sm:$0xff]  ;;  %v2056_v21 = vld [vmem:[%s2565_s30 + $0x90] sm:$0xff]  ;;  %p2343_p7 = scmp.ne.s32.totalorder %s2341_s11, %s2342_s23  ;;  %p2348_p11 = scmp.lt.s32.totalorder %s2346_s26, %s2342_s23 }
  0x32   : > { %1217 = vmatpush.bf16.msra.mxu1 %v2052_v6  ;;  %v2066_v15 = vld [vmem:[%s2565_s30 + $0xe0] sm:$0xff]  ;;  %v2065_v19 = vld [vmem:[%s2565_s30 + $0xd8] sm:$0xff]  ;;  %v2048_v22 = vld [vmem:[%s2565_s30 + $0x50] sm:$0xff] }
  0x33   : > { %1245 = vmatpush.bf16.msra.mxu3 %v2068_v7  ;;  %v2064_v23 = vld [vmem:[%s2565_s30 + $0xd0] sm:$0xff]  ;;  %v2039_v24 = vld [vmem:[%s2565_s30 + $0x8] sm:$0xff]  ;;  %v2038_v28 = vld [vmem:[%s2565_s30] sm:$0xff]  ;;  %p2344_p8 = pnand %p2343_p7, %p2525_p0  ;;  %p2349_p12 = por %p2348_p11, %p2347_p10 }
  0x34   : > { %1204 = vmatpush.bf16.msra.mxu0 %v2043_v8  ;;  %v2055_v25 = vld [vmem:[%s2565_s30 + $0x88] sm:$0xff]  ;;  %v2054_v29 = vld [vmem:[%s2565_s30 + $0x80] sm:$0xff]  ;;  %v2077_v30 = vld [vmem:[%s2565_s30 + $0x138] sm:$0xff] }
  0x35   : > { %1232 = vmatpush.bf16.msra.mxu2 %v2059_v9  ;;  %v2047_v26 = vld [vmem:[%s2565_s30 + $0x48] sm:$0xff]  ;;  %v2093_v31 = vld [vmem:[%s2565_s30 + $0x1b8] sm:$0xff]  ;;  %v2046_v32 = vld [vmem:[%s2565_s30 + $0x40] sm:$0xff]  ;;  %p2345_p9 = pneg %p2344_p8 }
  0x36   : > { %1218 = vmatpush.bf16.msra.mxu1 %v2051_v10  ;;  %v2063_v27 = vld [vmem:[%s2565_s30 + $0xc8] sm:$0xff]  ;;  %v2062_v33 = vld [vmem:[%s2565_s30 + $0xc0] sm:$0xff]  ;;  %v1555_v34 = vld [vmem:[#allocation3] sm:$0xf] }
  0x37   : > { %1246 = vmatpush.bf16.msra.mxu3 %v2067_v11  ;;  %v2031_v35 = vld [vmem:[#allocation3 + $0x30] sm:$0xf0]  ;;  %v1563_v36 = vld [vmem:[#allocation3 + $0x8] sm:$0xf]  ;;  %v2032_v37 = vld [vmem:[#allocation3 + $0x38] sm:$0xf0]  ;;  %p2350_p13 = pnand %p2349_p12, %p2345_p9 }
  0x38   : > { %1205 = vmatpush.bf16.msra.mxu0 %v2042_v12  ;;  %v2085_v38 = vld [vmem:[%s2565_s30 + $0x178] sm:$0xff]  ;;  %v1557_v41 = vld [vmem:[#allocation3 + $0x34] sm:$0xf0]  ;;  %v2026_v42 = vld [vmem:[#allocation3 + $0xc] sm:$0xf]  ;;  %v1556_v44 = vor.u32 %v2031_v35, %v1555_v34  ;;  %v1564_v45 = vor.u32 %v2032_v37, %v1563_v36 }
  0x39   : > { %1233 = vmatpush.bf16.msra.mxu2 %v2058_v13  ;;  %v2101_v39 = vld [vmem:[%s2565_s30 + $0x1f8] sm:$0xff]  ;;  %v2076_v46 = vld [vmem:[%s2565_s30 + $0x130] sm:$0xff]  ;;  %v2075_v52 = vld [vmem:[%s2565_s30 + $0x128] sm:$0xff] }
  0x3a   : > { %1219 = vmatpush.bf16.msra.mxu1 %v2050_v14  ;;  %v2025_v40 = vld [vmem:[#allocation3 + $0x4] sm:$0xf]  ;;  %v1565_v43 = vld [vmem:[#allocation3 + $0x3c] sm:$0xf0]  ;;  %v2092_v47 = vld [vmem:[%s2565_s30 + $0x1b0] sm:$0xff] }
  0x3b   : > { %1247 = vmatpush.bf16.msra.mxu3 %v2066_v15  ;;  %v1560_v48 = vor.u32 %v2025_v40, %v1557_v41  ;;  %v1568_v49 = vor.u32 %v2026_v42, %v1565_v43  ;;  %v2084_v50 = vld [vmem:[%s2565_s30 + $0x170] sm:$0xff]  ;;  %v2091_v53 = vld [vmem:[%s2565_s30 + $0x1a8] sm:$0xff]  ;;  %v2074_v56 = vld [vmem:[%s2565_s30 + $0x120] sm:$0xff] }
  0x3c   : > { %1206 = vmatpush.bf16.msra.mxu0 %v2041_v16  ;;  %v2100_v51 = vld [vmem:[%s2565_s30 + $0x1f0] sm:$0xff]  ;;  %v2083_v54 = vld [vmem:[%s2565_s30 + $0x168] sm:$0xff]  ;;  %v2090_v57 = vld [vmem:[%s2565_s30 + $0x1a0] sm:$0xff] }
  0x3d   : > { %1234 = vmatpush.bf16.msra.mxu2 %v2057_v17  ;;  %v2099_v55 = vld [vmem:[%s2565_s30 + $0x1e8] sm:$0xff]  ;;  %v2082_v58 = vld [vmem:[%s2565_s30 + $0x160] sm:$0xff]  ;;  %v2073_v60 = vld [vmem:[%s2565_s30 + $0x118] sm:$0xff] }
  0x3e   : > { %1220 = vmatpush.bf16.msra.mxu1 %v2049_v18  ;;  %v2098_v59 = vld [vmem:[%s2565_s30 + $0x1e0] sm:$0xff]  ;;  %v2089_v61 = vld [vmem:[%s2565_s30 + $0x198] sm:$0xff]  ;;  %v2072_v0 = vld [vmem:[%s2565_s30 + $0x110] sm:$0xff] }
  0x3f   : > { %1248 = vmatpush.bf16.msra.mxu3 %v2065_v19  ;;  %v2081_v62 = vld [vmem:[%s2565_s30 + $0x158] sm:$0xff]  ;;  %v2088_v1 = vld [vmem:[%s2565_s30 + $0x190] sm:$0xff]  ;;  %v2071_v4 = vld [vmem:[%s2565_s30 + $0x108] sm:$0xff] }
  0x40   : > { %1207 = vmatpush.bf16.msra.mxu0 %v2040_v20  ;;  %v2097_v63 = vld [vmem:[%s2565_s30 + $0x1d8] sm:$0xff]  ;;  %v2080_v2 = vld [vmem:[%s2565_s30 + $0x150] sm:$0xff]  ;;  %v2087_v5 = vld [vmem:[%s2565_s30 + $0x188] sm:$0xff] }
  0x41   : > { %1235 = vmatpush.bf16.msra.mxu2 %v2056_v21  ;;  %v2096_v3 = vld [vmem:[%s2565_s30 + $0x1d0] sm:$0xff]  ;;  %v2079_v6 = vld [vmem:[%s2565_s30 + $0x148] sm:$0xff]  ;;  %v2070_v8 = vld [vmem:[%s2565_s30 + $0x100] sm:$0xff] }
  0x42   : > { %1221 = vmatpush.bf16.msra.mxu1 %v2048_v22  ;;  %v2095_v7 = vld [vmem:[%s2565_s30 + $0x1c8] sm:$0xff]  ;;  %v2086_v9 = vld [vmem:[%s2565_s30 + $0x180] sm:$0xff]  ;;  %v2109_v10 = vld [vmem:[%s2565_s30 + $0x238] sm:$0xff] }
  0x43   : > { %1249 = vmatpush.bf16.msra.mxu3 %v2064_v23  ;;  %v2125_v11 = vld [vmem:[%s2565_s30 + $0x2b8] sm:$0xff]  ;;  %v1571_v12 = vld [vmem:[#allocation3 + $0x10] sm:$0xf]  ;;  %v1579_v14 = vld [vmem:[#allocation3 + $0x18] sm:$0xf] }
  0x44   : > { %1208 = vmatpush.bf16.msra.mxu0 %v2039_v24  ;;  %v2033_v13 = vld [vmem:[#allocation3 + $0x40] sm:$0xf0]  ;;  %v2034_v15 = vld [vmem:[#allocation3 + $0x48] sm:$0xf0]  ;;  %v2027_v18 = vld [vmem:[#allocation3 + $0x14] sm:$0xf] }
  0x45   : > { %1236 = vmatpush.bf16.msra.mxu2 %v2055_v25  ;;  %v2078_v16 = vld [vmem:[%s2565_s30 + $0x140] sm:$0xff]  ;;  %v2028_v20 = vld [vmem:[#allocation3 + $0x1c] sm:$0xf]  ;;  %v1581_v21 = vld [vmem:[#allocation3 + $0x4c] sm:$0xf0]  ;;  %v1572_v22 = vor.u32 %v2033_v13, %v1571_v12  ;;  %v1580_v23 = vor.u32 %v2034_v15, %v1579_v14 }
  0x46   : > { %1222 = vmatpush.bf16.msra.mxu1 %v2047_v26  ;;  %v2094_v17 = vld [vmem:[%s2565_s30 + $0x1c0] sm:$0xff]  ;;  %v2117_v24 = vld [vmem:[%s2565_s30 + $0x278] sm:$0xff]  ;;  %v2115_v34 = vld [vmem:[%s2565_s30 + $0x268] sm:$0xff] }
  0x47   : > { %1250 = vmatpush.bf16.msra.mxu3 %v2063_v27  ;;  %v1573_v19 = vld [vmem:[#allocation3 + $0x44] sm:$0xf0]  ;;  %v2133_v25 = vld [vmem:[%s2565_s30 + $0x2f8] sm:$0xff]  ;;  %v1584_v27 = vor.u32 %v2028_v20, %v1581_v21  ;;  %v2131_v35 = vld [vmem:[%s2565_s30 + $0x2e8] sm:$0xff] }
  0x48   : > { %1209 = vmatpush.bf16.msra.mxu0 %v2038_v28  ;;  %v1576_v26 = vor.u32 %v2027_v18, %v1573_v19  ;;  %v2108_v28 = vld [vmem:[%s2565_s30 + $0x230] sm:$0xff]  ;;  %v2106_v36 = vld [vmem:[%s2565_s30 + $0x220] sm:$0xff]  ;;  %v2105_v40 = vld [vmem:[%s2565_s30 + $0x218] sm:$0xff] }
  0x49   : > { %1237 = vmatpush.bf16.msra.mxu2 %v2054_v29  ;;  %v2124_v29 = vld [vmem:[%s2565_s30 + $0x2b0] sm:$0xff]  ;;  %v2122_v37 = vld [vmem:[%s2565_s30 + $0x2a0] sm:$0xff]  ;;  %v2121_v41 = vld [vmem:[%s2565_s30 + $0x298] sm:$0xff] }
  0x4a   : > { %1223 = vmatpush.bf16.msra.mxu1 %v2046_v32  ;;  %v2107_v32 = vld [vmem:[%s2565_s30 + $0x228] sm:$0xff]  ;;  %v2113_v42 = vld [vmem:[%s2565_s30 + $0x258] sm:$0xff] }
  0x4b   : > { %1251 = vmatpush.bf16.msra.mxu3 %v2062_v33  ;;  %1210 = vmatmul.bf16.vlgmr.msra.gmra.mxu0 %v1556_v44  ;;  %v2123_v33 = vld [vmem:[%s2565_s30 + $0x2a8] sm:$0xff]  ;;  %v2129_v43 = vld [vmem:[%s2565_s30 + $0x2d8] sm:$0xff]  ;;  %v2104_v44 = vld [vmem:[%s2565_s30 + $0x210] sm:$0xff] }
  0x4c   : > { %1258 = vmatpush.bf16.msrb.mxu0 %v2077_v30  ;;  %1238 = vmatmul.bf16.vlgmr.msra.gmra.mxu2 %v1564_v45  ;;  %v2116_v30 = vld [vmem:[%s2565_s30 + $0x270] sm:$0xff]  ;;  %v1603_v12 = vld [vmem:[#allocation3 + $0x30] sm:$0xf]  ;;  %v2037_v13 = vld [vmem:[#allocation3 + $0x60] sm:$0xf0] }
  0x4d   : > { %1286 = vmatpush.bf16.msrb.mxu2 %v2093_v31  ;;  %1224 = vmatmul.bf16.vlgmr.msra.gmra.mxu1 %v1560_v48  ;;  %v2132_v31 = vld [vmem:[%s2565_s30 + $0x2f0] sm:$0xff]  ;;  %v2103_v48 = vld [vmem:[%s2565_s30 + $0x208] sm:$0xff]  ;;  %v1604_v14 = vor.u32 %v2037_v13, %v1603_v12 }
  0x4e   : > { %1272 = vmatpush.bf16.msrb.mxu1 %v2085_v38  ;;  %1252 = vmatmul.bf16.vlgmr.msra.gmra.mxu3 %v1568_v49  ;;  %v2114_v38 = vld [vmem:[%s2565_s30 + $0x260] sm:$0xff]  ;;  %v2120_v45 = vld [vmem:[%s2565_s30 + $0x290] sm:$0xff]  ;;  %v2119_v49 = vld [vmem:[%s2565_s30 + $0x288] sm:$0xff] }
  0x4f   : > { %1300 = vmatpush.bf16.msrb.mxu3 %v2101_v39  ;;  %v2130_v39 = vld [vmem:[%s2565_s30 + $0x2e0] sm:$0xff] }
  0x50   : > { %1259 = vmatpush.bf16.msrb.mxu0 %v2076_v46  ;;  %v2112_v46 = vld [vmem:[%s2565_s30 + $0x250] sm:$0xff] }
  0x51   : > { %1287 = vmatpush.bf16.msrb.mxu2 %v2092_v47  ;;  %v2128_v47 = vld [vmem:[%s2565_s30 + $0x2d0] sm:$0xff] }
  0x52   : > { %1273 = vmatpush.bf16.msrb.mxu1 %v2084_v50  ;;  %v2111_v50 = vld [vmem:[%s2565_s30 + $0x248] sm:$0xff] }
  0x53   : > { %1301 = vmatpush.bf16.msrb.mxu3 %v2100_v51  ;;  %v2127_v51 = vld [vmem:[%s2565_s30 + $0x2c8] sm:$0xff] }
  0x54   : > { %1260 = vmatpush.bf16.msrb.mxu0 %v2075_v52  ;;  %v2102_v52 = vld [vmem:[%s2565_s30 + $0x200] sm:$0xff] }
  0x55   : > { %1288 = vmatpush.bf16.msrb.mxu2 %v2091_v53  ;;  %v2118_v53 = vld [vmem:[%s2565_s30 + $0x280] sm:$0xff] }
  0x56   : > { %1274 = vmatpush.bf16.msrb.mxu1 %v2083_v54  ;;  %v2141_v54 = vld [vmem:[%s2565_s30 + $0x338] sm:$0xff] }
  0x57   : > { %1302 = vmatpush.bf16.msrb.mxu3 %v2099_v55  ;;  %v1587_v55 = vld [vmem:[#allocation3 + $0x20] sm:$0xf] }
  0x58   : > { %1261 = vmatpush.bf16.msrb.mxu0 %v2074_v56  ;;  %v2035_v56 = vld [vmem:[#allocation3 + $0x50] sm:$0xf0] }
  0x59   : > { %1289 = vmatpush.bf16.msrb.mxu2 %v2090_v57  ;;  %v1595_v57 = vld [vmem:[#allocation3 + $0x28] sm:$0xf] }
  0x5a   : > { %1275 = vmatpush.bf16.msrb.mxu1 %v2082_v58  ;;  %v2036_v58 = vld [vmem:[#allocation3 + $0x58] sm:$0xf0] }
  0x5b   : > { %1303 = vmatpush.bf16.msrb.mxu3 %v2098_v59  ;;  %v2110_v59 = vld [vmem:[%s2565_s30 + $0x240] sm:$0xff] }
  0x5c   : > { %1262 = vmatpush.bf16.msrb.mxu0 %v2073_v60  ;;  %v2126_v60 = vld [vmem:[%s2565_s30 + $0x2c0] sm:$0xff] }
  0x5d   : > { %1290 = vmatpush.bf16.msrb.mxu2 %v2089_v61  ;;  %v2029_v61 = vld [vmem:[#allocation3 + $0x24] sm:$0xf] }
  0x5e   : > { %1276 = vmatpush.bf16.msrb.mxu1 %v2081_v62  ;;  %v1589_v62 = vld [vmem:[#allocation3 + $0x54] sm:$0xf0] }
  0x5f   : > { %1304 = vmatpush.bf16.msrb.mxu3 %v2097_v63  ;;  %v2030_v63 = vld [vmem:[#allocation3 + $0x2c] sm:$0xf] }
  0x60   : > { %1263 = vmatpush.bf16.msrb.mxu0 %v2072_v0  ;;  %v1597_v0 = vld [vmem:[#allocation3 + $0x5c] sm:$0xf0] }
  0x61   : > { %1291 = vmatpush.bf16.msrb.mxu2 %v2088_v1  ;;  %v1588_v1 = vor.u32 %v2035_v56, %v1587_v55 }
  0x62   : > { %1277 = vmatpush.bf16.msrb.mxu1 %v2080_v2  ;;  %v1596_v2 = vor.u32 %v2036_v58, %v1595_v57 }
  0x63   : > { %1305 = vmatpush.bf16.msrb.mxu3 %v2096_v3  ;;  %v1592_v3 = vor.u32 %v2029_v61, %v1589_v62  ;;  %v2235_v62 = vld [vmem:[%s250_s6] ss:$0 sm:$0xff] }
  0x64   : > { %1264 = vmatpush.bf16.msrb.mxu0 %v2071_v4  ;;  %v1600_v4 = vor.u32 %v2030_v63, %v1597_v0 }
  0x65   : > { %1292 = vmatpush.bf16.msrb.mxu2 %v2087_v5  ;;  %v2140_v5 = vld [vmem:[%s2565_s30 + $0x330] sm:$0xff] }
  0x66   : > { %1278 = vmatpush.bf16.msrb.mxu1 %v2079_v6  ;;  %v2139_v6 = vld [vmem:[%s2565_s30 + $0x328] sm:$0xff] }
  0x67   : > { %1306 = vmatpush.bf16.msrb.mxu3 %v2095_v7  ;;  %v2138_v7 = vld [vmem:[%s2565_s30 + $0x320] sm:$0xff] }
  0x68   : > { %1265 = vmatpush.bf16.msrb.mxu0 %v2070_v8  ;;  %v2137_v8 = vld [vmem:[%s2565_s30 + $0x318] sm:$0xff] }
  0x69   : > { %1293 = vmatpush.bf16.msrb.mxu2 %v2086_v9  ;;  %v2136_v9 = vld [vmem:[%s2565_s30 + $0x310] sm:$0xff] }
  0x6a   : > { %1279 = vmatpush.bf16.msrb.mxu1 %v2078_v16 }
  0x6b   : > { %1307 = vmatpush.bf16.msrb.mxu3 %v2094_v17  ;;  %1266 = vmatmul.bf16.vlgmr.msrb.gmra.mxu0 %v1572_v22 }
  0x6c   : > { %1314 = vmatpush.bf16.msra.mxu0 %v2109_v10  ;;  %1294 = vmatmul.bf16.vlgmr.msrb.gmra.mxu2 %v1580_v23  ;;  %v2135_v10 = vld [vmem:[%s2565_s30 + $0x308] sm:$0xff] }
  0x6d   : > { %1342 = vmatpush.bf16.msra.mxu2 %v2125_v11  ;;  %1280 = vmatmul.bf16.vlgmr.msrb.gmra.mxu1 %v1576_v26  ;;  %v2134_v11 = vld [vmem:[%s2565_s30 + $0x300] sm:$0xff] }
  0x6e   : > { %1328 = vmatpush.bf16.msra.mxu1 %v2117_v24  ;;  %1308 = vmatmul.bf16.vlgmr.msrb.gmra.mxu3 %v1584_v27 }
  0x6f   : > { %1356 = vmatpush.bf16.msra.mxu3 %v2133_v25 }
  0x70   : > { %1315 = vmatpush.bf16.msra.mxu0 %v2108_v28 }
  0x71   : > { %1343 = vmatpush.bf16.msra.mxu2 %v2124_v29 }
  0x72   : > { %1329 = vmatpush.bf16.msra.mxu1 %v2116_v30 }
  0x73   : > { %1357 = vmatpush.bf16.msra.mxu3 %v2132_v31 }
  0x74   : > { %1316 = vmatpush.bf16.msra.mxu0 %v2107_v32 }
  0x75   : > { %1344 = vmatpush.bf16.msra.mxu2 %v2123_v33 }
  0x76   : > { %1330 = vmatpush.bf16.msra.mxu1 %v2115_v34 }
  0x77   : > { %1358 = vmatpush.bf16.msra.mxu3 %v2131_v35 }
  0x78   : > { %1317 = vmatpush.bf16.msra.mxu0 %v2106_v36 }
  0x79   : > { %1345 = vmatpush.bf16.msra.mxu2 %v2122_v37 }
  0x7a   : > { %1331 = vmatpush.bf16.msra.mxu1 %v2114_v38 }
  0x7b   : > { %1359 = vmatpush.bf16.msra.mxu3 %v2130_v39 }
  0x7c   : > { %1318 = vmatpush.bf16.msra.mxu0 %v2105_v40 }
  0x7d   : > { %1346 = vmatpush.bf16.msra.mxu2 %v2121_v41 }
  0x7e   : > { %1332 = vmatpush.bf16.msra.mxu1 %v2113_v42 }
  0x7f   : > { %1360 = vmatpush.bf16.msra.mxu3 %v2129_v43 }
  0x80   : > { %1319 = vmatpush.bf16.msra.mxu0 %v2104_v44 }
  0x81   : > { %1347 = vmatpush.bf16.msra.mxu2 %v2120_v45 }
  0x82   : > { %1333 = vmatpush.bf16.msra.mxu1 %v2112_v46 }
  0x83   : > { %1361 = vmatpush.bf16.msra.mxu3 %v2128_v47 }
  0x84   : > { %1320 = vmatpush.bf16.msra.mxu0 %v2103_v48 }
  0x85   : > { %1348 = vmatpush.bf16.msra.mxu2 %v2119_v49 }
  0x86   : > { %1334 = vmatpush.bf16.msra.mxu1 %v2111_v50 }
  0x87   : > { %1362 = vmatpush.bf16.msra.mxu3 %v2127_v51 }
  0x88   : > { %1321 = vmatpush.bf16.msra.mxu0 %v2102_v52 }
  0x89   : > { %1349 = vmatpush.bf16.msra.mxu2 %v2118_v53 }
  0x8a   : > { %1335 = vmatpush.bf16.msra.mxu1 %v2110_v59 }
  0x8b   : > { %1363 = vmatpush.bf16.msra.mxu3 %v2126_v60  ;;  %1322 = vmatmul.bf16.vlgmr.msra.gmra.mxu0 %v1588_v1 }
  0x8c   : > { %1370 = vmatpush.bf16.msrb.mxu0 %v2141_v54  ;;  %1350 = vmatmul.bf16.vlgmr.msra.gmra.mxu2 %v1596_v2 }
  0x8d   : > { %1336 = vmatmul.bf16.vlgmr.msra.gmra.mxu1 %v1592_v3 }
  0x8e   : > { %1364 = vmatmul.bf16.vlgmr.msra.gmra.mxu3 %v1600_v4 }
  0x90   : > { %1371 = vmatpush.bf16.msrb.mxu0 %v2140_v5 }
  0x94   : > { %1372 = vmatpush.bf16.msrb.mxu0 %v2139_v6 }
  0x98   : > { %1373 = vmatpush.bf16.msrb.mxu0 %v2138_v7 }
  0x9c   : > { %1374 = vmatpush.bf16.msrb.mxu0 %v2137_v8 }
  0xa0   : > { %1375 = vmatpush.bf16.msrb.mxu0 %v2136_v9 }
  0xa4   : > { %1376 = vmatpush.bf16.msrb.mxu0 %v2135_v10 }
  0xa8   : > { %1377 = vmatpush.bf16.msrb.mxu0 %v2134_v11 }
  0xab   : > { %1378 = vmatmul.bf16.vlgmr.msrb.gmra.mxu0 %v1604_v14 }
  0xc8   : > { %v1211_v15 = vpop.f32.mrf.mxu0 }
  0xca   : > { %v1225_v16 = vpop.f32.mrf.mxu1 }
  0xcb   : > { %v1226_v24 = vadd.f32 %v1225_v16, %v1211_v15 }
  0xcf   : > { %v1239_v17 = vpop.f32.mrf.mxu2 }
  0xd0   : > { %v1213_v18 = vpop.f32.mrf.mxu0  ;;  %v1240_v26 = vadd.f32 %v1239_v17, %v1226_v24 }
  0xd1   : > { %v1253_v19 = vpop.f32.mrf.mxu3 }
  0xd2   : > { %v1227_v20 = vpop.f32.mrf.mxu1  ;;  %v1254_v29 = vadd.f32 %v1253_v19, %v1240_v26 }
  0xd3   : > { %v1228_v30 = vadd.f32 %v1227_v20, %v1213_v18 }
  0xd7   : > { %v1241_v21 = vpop.f32.mrf.mxu2 }
  0xd8   : > { %v1242_v32 = vadd.f32 %v1241_v21, %v1228_v30 }
  0xd9   : > { %v1255_v23 = vpop.f32.mrf.mxu3 }
  0xda   : > { %v1256_v37 = vadd.f32 %v1255_v23, %v1242_v32 }
  0xe8   : > { %v1267_v22 = vpop.f32.mrf.mxu0 }
  0xe9   : > { %v1268_v33 = vadd.f32 %v1267_v22, %v1254_v29 }
  0xea   : > { %v1281_v25 = vpop.f32.mrf.mxu1 }
  0xeb   : > { %v1282_v38 = vadd.f32 %v1281_v25, %v1268_v33 }
  0xef   : > { %v1295_v27 = vpop.f32.mrf.mxu2 }
  0xf0   : > { %v1269_v28 = vpop.f32.mrf.mxu0  ;;  %v1296_v41 = vadd.f32 %v1295_v27, %v1282_v38 }
  0xf1   : > { %v1309_v31 = vpop.f32.mrf.mxu3  ;;  %v1270_v39 = vadd.f32 %v1269_v28, %v1256_v37 }
  0xf2   : > { %v1283_v34 = vpop.f32.mrf.mxu1  ;;  %v1310_v45 = vadd.f32 %v1309_v31, %v1296_v41 }
  0xf3   : > { %v1284_v43 = vadd.f32 %v1283_v34, %v1270_v39 }
  0xf7   : > { %v1297_v35 = vpop.f32.mrf.mxu2 }
  0xf8   : > { %v1298_v46 = vadd.f32 %v1297_v35, %v1284_v43 }
  0xf9   : > { %v1311_v40 = vpop.f32.mrf.mxu3 }
  0xfa   : > { %v1312_v50 = vadd.f32 %v1311_v40, %v1298_v46 }
 0x108   : > { %v1323_v36 = vpop.f32.mrf.mxu0 }
 0x109   : > { %v1324_v48 = vadd.f32 %v1323_v36, %v1310_v45 }
 0x10a   : > { %v1337_v42 = vpop.f32.mrf.mxu1 }
 0x10b   : > { %v1338_v51 = vadd.f32 %v1337_v42, %v1324_v48 }
 0x10f   : > { %v1351_v44 = vpop.f32.mrf.mxu2 }
 0x110   : > { %v1325_v47 = vpop.f32.mrf.mxu0  ;;  %v1352_v54 = vadd.f32 %v1351_v44, %v1338_v51 }
 0x111   : > { %v1365_v49 = vpop.f32.mrf.mxu3  ;;  %v1326_v52 = vadd.f32 %v1325_v47, %v1312_v50 }
 0x112   : > { %v1339_v53 = vpop.f32.mrf.mxu1  ;;  %v1366_v58 = vadd.f32 %v1365_v49, %v1352_v54 }
 0x113   : > { %v1340_v57 = vadd.f32 %v1339_v53, %v1326_v52 }
 0x117   : > { %v1353_v55 = vpop.f32.mrf.mxu2 }
 0x118   : > { %v1354_v59 = vadd.f32 %v1353_v55, %v1340_v57 }
 0x119   : > { %v1367_v60 = vpop.f32.mrf.mxu3 }
 0x11a   : > { %v1368_v63 = vadd.f32 %v1367_v60, %v1354_v59 }
 0x128   : > { %v1379_v56 = vpop.f32.mrf.mxu0 }
 0x129   : > { %v1380_v61 = vadd.f32 %v1379_v56, %v1366_v58 }
 0x12b   : > { %v1397_v1 = vadd.f32 %v2235_v62, %v1380_v61 }
 0x12d   : > { %v1399_v4 = vmax.f32 %v1397_v1, 0.0 }
 0x130   : > { %v1381_v0 = vpop.f32.mrf.mxu0 }
 0x131   : > { %v1382_v2 = vadd.f32 %v1381_v0, %v1368_v63 }
 0x133   : > { %v1398_v3 = vadd.f32 %v2235_v62, %v1382_v2 }
 0x135   : > { %v1400_v5 = vmax.f32 %v1398_v3, 0.0 }
 0x137   : > { %v2145_v6 = vpack.c.bf16 %v1400_v5, %v1399_v4 }
 0x139   : > { %2146 = vst [vmem:[%s277_s7] sm:$0xff] %v2145_v6  }
 0x13a   : > { %2353 = shalt.err (!%p2350_p13)
}
 0x13b   : > { %s2420_s28 = smov 64   ;;  %s2421_s6 = smov 128  }
 0x13c   : > { %s2422_s10 = smov 4  }
 0x13d   : > { %2157 = dma.vmem_to_hbm [thread:$0]  (%p2525_p0), %s1421_s8, 128, %s1423_s9, %s1406_s15, %s2420_s28, %s2421_s6, %s2422_s10  }
 0x13e PF: > { %s1437_s19 = sand.u32 1, %s2392_s12   ;;  %p2171_p4 = pnand %p1548_p3, %p2529_p2 }
 0x13f   : > { %s1438_s27 = scalar_lea.sflag [#allocation5], %s1437_s19 }
 0x140   : > { %p2172_p5 = pneg %p2171_p4 }
 0x142   : > { %2387 = dma.done.wait (%p2172_p5), %s1438_s27, 128  }
 0x143   : > { %2389 = vsyncadd (%p2172_p5), %s1438_s27, 4294967168  ;;  %s20_s17 = sadd.s32 1, %s2412_s17   ;;  %s2726_s12 = smov %s2396_s13 }
 0x144   : > { %p17_p1 = scmp.ge.s32.totalorder %s20_s17, 4   ;;  %s2727_s13 = smov %s2400_s14 }
 0x145   : > { %s2728_s14 = smov %s2491_s24  ;;  %s2729_s15 = smov %s2408_s16 }
 0x146   : > { %s2730_s16 = smov %s2732_s18  ;;  %19 = sbr.rel (!%p17_p1) target bundleno = 7 (0x7), region = 102 }
 0x14b   :  { %1444 = vsyncpa [#allocation4], 1 }
 0x14c   :  { %1446 = vsyncpa [#allocation4 + $0x1], 1 }
 0x14d   :  { %1447 = vsyncpa [#allocation7], 1 }
 0x14e   :  { %1449 = vsyncpa [#allocation7 + $0x1], 1 }
 0x14f   :  { %1450 = vsyncpa [#allocation5], 1 }
 0x150   :  { %1452 = vsyncpa [#allocation5 + $0x1], 1 }

</bundles_post_ra>
